<compile_context>
chip_gen: v5e
topology: v5e:2x2
jax: 0.10.0
libtpu: 0.0.40
codegen_flags: <defaults>
</compile_context>

<pallas_src>
import jax
import jax.numpy as jnp
from jax.experimental import pallas as pl
from jax.experimental.pallas import tpu as pltpu


def _make_kernel(S, s_tile):
    mask_tail = (S % s_tile) != 0
    tail_valid = S % s_tile  # static; only used when mask_tail

    def kernel(x_ref, w1t_ref, w2t_ref, o_ref, max_acc):
        # x_ref  : (1, C, s_tile)  chunk of flattened spatial axis (VMEM)
        # w1t_ref: (C, Ch)  f32    fc1 weight, pre-transposed to (in, out)
        # w2t_ref: (Ch, C)  f32    fc2 weight, pre-transposed to (in, out)
        # o_ref  : (1, 1, C)       per-batch output row
        # max_acc: (1, C)   f32    running spatial max (persists across k)
        k = pl.program_id(1)
        n_k = pl.num_programs(1)

        @pl.when(k == 0)
        def _init():
            max_acc[...] = jnp.full(max_acc.shape, -jnp.inf, dtype=max_acc.dtype)

        if not mask_tail:
            # Streaming path: pure load + lane-max, no masking overhead.
            part = jnp.max(x_ref[...], axis=-1)                       # (1, C)
            max_acc[...] = jnp.maximum(max_acc[...], part.astype(jnp.float32))
        else:
            @pl.when(k < n_k - 1)
            def _body():
                part = jnp.max(x_ref[...], axis=-1)                   # (1, C)
                max_acc[...] = jnp.maximum(max_acc[...], part.astype(jnp.float32))

            @pl.when(k == n_k - 1)
            def _tail():
                # Only the final block extends past S: mask padded lanes to -inf.
                chunk = x_ref[...]                                    # (1, C, s_tile)
                lane = jax.lax.broadcasted_iota(jnp.int32, (1, 1, s_tile), 2)
                masked = jnp.where(lane < tail_valid, chunk,
                                   jnp.array(-jnp.inf, dtype=chunk.dtype))
                part = jnp.max(masked, axis=-1)                       # (1, C)
                max_acc[...] = jnp.maximum(max_acc[...], part.astype(jnp.float32))

        @pl.when(k == n_k - 1)
        def _finalize():
            pooled = max_acc[...]                                     # (1, C) f32
            h = jnp.maximum(
                jnp.dot(pooled, w1t_ref[...], preferred_element_type=jnp.float32),
                0.0)                                                  # (1, Ch)
            out = jnp.dot(h, w2t_ref[...],
                          preferred_element_type=jnp.float32)         # (1, C)
            out = jax.nn.sigmoid(out)
            o_ref[...] = out.reshape(o_ref.shape).astype(o_ref.dtype)

    return kernel


def _tpu_vmem_capacity_bytes():
    try:
        return int(pltpu.get_tpu_info().vmem_capacity_bytes)
    except Exception:
        return 64 * 1024 * 1024  # assume the smallest (v7x per-TC) when unknown


def _x_block_spec(C, s_tile, want_bufs):
    index_map = lambda b, k: (b, 0, k)
    if want_bufs != 2:
        try:
            spec = pl.BlockSpec((1, C, s_tile), index_map,
                                pipeline_mode=pl.Buffered(want_bufs))
            return spec, want_bufs
        except Exception:
            pass  # pipeline_mode unsupported -> default double-buffering
    return pl.BlockSpec((1, C, s_tile), index_map), 2


def channel_attention(x, w1, w2, *, s_tile=None):
    """x: (B, C, H, W); w1: (C//16, C); w2: (C, C//16) (1x1 conv weights, squeezed).
    Returns sigmoid channel-attention weights of shape (B, C, 1, 1)."""
    B, C, H, W = x.shape
    Ch = w1.shape[0]
    assert w1.shape == (Ch, C) and w2.shape == (C, Ch) and Ch >= 1
    # Tail masking uses -inf, so the streaming dtype must be floating point.
    assert jnp.issubdtype(x.dtype, jnp.floating)
    S = H * W
    elt = jnp.dtype(x.dtype).itemsize

    # ---- generation-aware tile / VMEM budget ----------------------------------
    cap = _tpu_vmem_capacity_bytes()
    # Total pipeline footprint target: ~24 MiB on v7x (64 MiB VMEM/TC),
    # ~48 MiB on v5e/v6e (128 MiB VMEM).
    total_budget = (24 << 20) if cap <= (64 << 20) else (48 << 20)
    per_buf_budget = min(4 << 20, total_budget // 5)   # 2-4 MiB per x buffer

    if s_tile is None:
        lanes = per_buf_budget // max(C * elt, 1)
        s_tile = max(512, (lanes // 128) * 128)        # >= 2 KiB contiguous per row
    if s_tile >= S:
        s_tile = S                                     # single full-extent block
    else:
        s_tile = max(128, (s_tile // 128) * 128)       # lane-aligned tile
    n_k = pl.cdiv(S, s_tile)

    x_flat = x.reshape(B, C, S)
    w1t = w1.T.astype(jnp.float32)                     # (C, Ch): transpose + cast once
    w2t = w2.T.astype(jnp.float32)                     # (Ch, C)

    # Deeper input buffering only pays off when the reduction has several steps.
    want_bufs = 3 if n_k >= 3 else 2
    x_spec, n_xbuf = _x_block_spec(C, s_tile, want_bufs)

    # ---- VMEM footprint & limit (never below the real requirement) ------------
    x_block_bytes = C * s_tile * elt
    w_bytes_total = 2 * C * Ch * 4                     # w1t + w2t, f32
    out_bytes = C * elt
    vmem_need = (n_xbuf * x_block_bytes            # pipelined x buffers
                 + 2 * w_bytes_total               # (double-buffered) weights
                 + 2 * out_bytes                   # output block
                 + C * 4)                          # f32 scratch accumulator
    vmem_limit = int(vmem_need * 1.25) + (1 << 20)
    vmem_limit = min(max(vmem_limit, 4 << 20), total_budget)
    vmem_limit = max(vmem_limit, vmem_need + (512 << 10))

    cost = pl.CostEstimate(
        flops=4 * B * C * Ch,
        transcendentals=B * C,
        bytes_accessed=int(B * C * S * elt + w_bytes_total + B * C * elt),
    )

    out = pl.pallas_call(
        _make_kernel(S, s_tile),
        out_shape=jax.ShapeDtypeStruct((B, 1, C), x.dtype),
        grid_spec=pltpu.PrefetchScalarGridSpec(
            num_scalar_prefetch=0,
            grid=(B, n_k),
            in_specs=[
                x_spec,
                pl.BlockSpec((C, Ch), lambda b, k: (0, 0)),
                pl.BlockSpec((Ch, C), lambda b, k: (0, 0)),
            ],
            out_specs=pl.BlockSpec((1, 1, C), lambda b, k: (b, 0, 0)),
            scratch_shapes=[pltpu.VMEM((1, C), jnp.float32)],
        ),
        compiler_params=pltpu.CompilerParams(
            dimension_semantics=("parallel", "arbitrary"),
            vmem_limit_bytes=int(vmem_limit),
        ),
        cost_estimate=cost,
    )(x_flat, w1t, w2t)

    return out.reshape(B, C, 1, 1)


def channel_attention_ref(x, w1, w2):
    # Pure-JAX reference mirroring the PyTorch forward.
    pooled = jnp.max(x.astype(jnp.float32), axis=(2, 3))              # (B, C)
    h = jnp.maximum(pooled @ w1.astype(jnp.float32).T, 0.0)           # (B, C//16)
    out = jax.nn.sigmoid(h @ w2.astype(jnp.float32).T)                # (B, C)
    return out[:, :, None, None]


if __name__ == "__main__":
    B, C, H, W = 2, 32, 16, 16        # in_planes=32 -> hidden = 32 // 16 = 2
    Ch = C // 16

    key = jax.random.PRNGKey(0)
    kx, k1, k2, k3, k4 = jax.random.split(key, 5)
    x = jax.random.normal(kx, (B, C, H, W), dtype=jnp.float32)
    # Deterministic "kaiming-ish" init for the 1x1 conv weights (bias=False).
    w1 = jax.random.normal(k1, (Ch, C), dtype=jnp.float32) * (2.0 / C) ** 0.5
    w2 = jax.random.normal(k2, (C, Ch), dtype=jnp.float32) * (2.0 / Ch) ** 0.5

    # (1) S=256 with s_tile=128 -> 2 reduction steps: exercises the running-max
    #     accumulator and the finalize MLP.
    out = jax.block_until_ready(channel_attention(x, w1, w2, s_tile=128))
    ref = channel_attention_ref(x, w1, w2)
    assert out.shape == (B, C, 1, 1)
    assert jnp.allclose(out, ref, atol=1e-5, rtol=1e-5)

    # (2) S=144 not a multiple of 128 -> last-step tail-mask path.
    x2 = jax.random.normal(k3, (B, C, 12, 12), dtype=jnp.float32)
    out2 = jax.block_until_ready(channel_attention(x2, w1, w2, s_tile=128))
    assert jnp.allclose(out2, channel_attention_ref(x2, w1, w2), atol=1e-5, rtol=1e-5)

    # (3) B=1, S=1024, s_tile=128 -> 8 reduction steps: exercises the deeper
    #     (3x) input buffering path.
    x3 = jax.random.normal(k4, (1, C, 32, 32), dtype=jnp.float32)
    out3 = jax.block_until_ready(channel_attention(x3, w1, w2, s_tile=128))
    assert jnp.allclose(out3, channel_attention_ref(x3, w1, w2), atol=1e-5, rtol=1e-5)

    # (4) bf16 activations stay bf16 in the HBM-streaming path (half the bytes).
    xb = x.astype(jnp.bfloat16)
    outb = jax.block_until_ready(channel_attention(xb, w1, w2, s_tile=128))
    assert jnp.allclose(outb.astype(jnp.float32),
                        channel_attention_ref(xb, w1, w2), atol=1e-2)

    # (5) auto tile selection path (single full-extent block at this size).
    out5 = jax.block_until_ready(channel_attention(x, w1, w2))
    assert jnp.allclose(out5, ref, atol=1e-5, rtol=1e-5)

    print("KERNEL_OK")
</pallas_src>

<mosaic_0001>
module attributes {stable_mosaic.version = 11 : i64} {
  func.func @kernel(%arg0: i32, %arg1: i32, %arg2: memref<1x32x128xf32, #tpu.memory_space<vmem>>, %arg3: memref<32x2xf32, #tpu.memory_space<vmem>>, %arg4: memref<2x32xf32, #tpu.memory_space<vmem>>, %arg5: memref<1x1x32xf32, #tpu.memory_space<vmem>>, %arg6: memref<1x32xf32, #tpu.memory_space<vmem>>) attributes {dimension_semantics = [#tpu.dimension_semantics<parallel>, #tpu.dimension_semantics<arbitrary>], iteration_bounds = array<i64: 2, 2>, scalar_prefetch = 0 : i64, scratch_operands = 1 : i64, tpu.core_type = #tpu.core_type<tc>, window_params = [{transform_indices = @transform_0, window_bounds = array<i64: 1, 32, 128>}, {pipeline_mode = #tpu.pipeline_mode<synchronous>, transform_indices = @transform_1, window_bounds = array<i64: 32, 2>}, {pipeline_mode = #tpu.pipeline_mode<synchronous>, transform_indices = @transform_2, window_bounds = array<i64: 2, 32>}, {transform_indices = @transform_3, window_bounds = array<i64: 1, 1, 32>}]} {
    %c0_i32 = arith.constant 0 : i32
    %0 = arith.cmpi eq, %arg1, %c0_i32 : i32
    %1 = arith.extui %0 : i1 to i32
    %c0_i32_0 = arith.constant 0 : i32
    %2 = arith.cmpi ne, %1, %c0_i32_0 : i32
    scf.if %2 {
      %cst_8 = arith.constant 0xFF800000 : f32
      %11 = vector.broadcast %cst_8 : f32 to vector<1x32xf32>
      %c0_9 = arith.constant 0 : index
      %c0_10 = arith.constant 0 : index
      %12 = vector.load %arg6[%c0_9, %c0_10] : memref<1x32xf32, #tpu.memory_space<vmem>>, vector<1x32xf32>
      tpu.vector_store %arg6[%c0_9, %c0_10], %11 {strides = array<i32>} : memref<1x32xf32, #tpu.memory_space<vmem>>, vector<1x32xf32>,
    } else {
    }
    %c0 = arith.constant 0 : index
    %c0_1 = arith.constant 0 : index
    %c0_2 = arith.constant 0 : index
    %3 = vector.load %arg2[%c0, %c0_1, %c0_2] : memref<1x32x128xf32, #tpu.memory_space<vmem>>, vector<1x32x128xf32>
    %cst = arith.constant dense<0xFF800000> : vector<1x32xf32>
    %4 = vector.multi_reduction <maximumf>, %3, %cst [2] : vector<1x32x128xf32> to vector<1x32xf32>
    %c0_3 = arith.constant 0 : index
    %c0_4 = arith.constant 0 : index
    %5 = vector.load %arg6[%c0_3, %c0_4] : memref<1x32xf32, #tpu.memory_space<vmem>>, vector<1x32xf32>
    %6 = arith.maximumf %5, %4 : vector<1x32xf32>
    %c0_5 = arith.constant 0 : index
    %c0_6 = arith.constant 0 : index
    %7 = vector.load %arg6[%c0_5, %c0_6] : memref<1x32xf32, #tpu.memory_space<vmem>>, vector<1x32xf32>
    tpu.vector_store %arg6[%c0_5, %c0_6], %6 {strides = array<i32>} : memref<1x32xf32, #tpu.memory_space<vmem>>, vector<1x32xf32>,
    %c1_i32 = arith.constant 1 : i32
    %8 = arith.cmpi eq, %arg1, %c1_i32 : i32
    %9 = arith.extui %8 : i1 to i32
    %c0_i32_7 = arith.constant 0 : i32
    %10 = arith.cmpi ne, %9, %c0_i32_7 : i32
    scf.if %10 {
      %c0_8 = arith.constant 0 : index
      %c0_9 = arith.constant 0 : index
      %11 = vector.load %arg6[%c0_8, %c0_9] : memref<1x32xf32, #tpu.memory_space<vmem>>, vector<1x32xf32>
      %c0_10 = arith.constant 0 : index
      %c0_11 = arith.constant 0 : index
      %12 = vector.load %arg3[%c0_10, %c0_11] : memref<32x2xf32, #tpu.memory_space<vmem>>, vector<32x2xf32>
      %cst_12 = arith.constant dense<0.000000e+00> : vector<1x2xf32>
      %13 = tpu.matmul %11, %12, %cst_12 {dimension_numbers = #tpu.dot_dimension_numbers<[1], [0], [0], [1], [0, 0, 1, 1], [], []>} : vector<1x32xf32>, vector<32x2xf32>, vector<1x2xf32> -> vector<1x2xf32>
      %cst_13 = arith.constant 0.000000e+00 : f32
      %14 = vector.broadcast %cst_13 : f32 to vector<1x2xf32>
      %15 = arith.maximumf %13, %14 : vector<1x2xf32>
      %c0_14 = arith.constant 0 : index
      %c0_15 = arith.constant 0 : index
      %16 = vector.load %arg4[%c0_14, %c0_15] : memref<2x32xf32, #tpu.memory_space<vmem>>, vector<2x32xf32>
      %cst_16 = arith.constant dense<0.000000e+00> : vector<1x32xf32>
      %17 = tpu.matmul %15, %16, %cst_16 {dimension_numbers = #tpu.dot_dimension_numbers<[1], [0], [0], [1], [0, 0, 1, 1], [], []>} : vector<1x2xf32>, vector<2x32xf32>, vector<1x32xf32> -> vector<1x32xf32>
      %18 = arith.negf %17 : vector<1x32xf32>
      %19 = math.exp %18 : vector<1x32xf32>
      %cst_17 = arith.constant 1.000000e+00 : f32
      %20 = vector.broadcast %cst_17 : f32 to vector<1x32xf32>
      %21 = arith.addf %20, %19 : vector<1x32xf32>
      %22 = arith.divf %20, %21 : vector<1x32xf32>
      %23 = vector.shape_cast %22 : vector<1x32xf32> to vector<1x1x32xf32>
      %c0_18 = arith.constant 0 : index
      %c0_19 = arith.constant 0 : index
      %c0_20 = arith.constant 0 : index
      %24 = vector.load %arg5[%c0_18, %c0_19, %c0_20] : memref<1x1x32xf32, #tpu.memory_space<vmem>>, vector<1x1x32xf32>
      tpu.vector_store %arg5[%c0_18, %c0_19, %c0_20], %23 {strides = array<i32>} : memref<1x1x32xf32, #tpu.memory_space<vmem>>, vector<1x1x32xf32>,
    } else {
    }
    return
  }
  func.func @transform_0(%arg0: i32, %arg1: i32) -> (i32, i32, i32) {
    %c0_i32 = arith.constant 0 : i32
    %c0_i32_0 = arith.constant 0 : i32
    return %arg0, %c0_i32, %arg1 : i32, i32, i32
  }
  func.func @transform_1(%arg0: i32, %arg1: i32) -> (i32, i32) {
    %c0_i32 = arith.constant 0 : i32
    %c0_i32_0 = arith.constant 0 : i32
    %c0_i32_1 = arith.constant 0 : i32
    return %c0_i32, %c0_i32_0 : i32, i32
  }
  func.func @transform_2(%arg0: i32, %arg1: i32) -> (i32, i32) {
    %c0_i32 = arith.constant 0 : i32
    %c0_i32_0 = arith.constant 0 : i32
    %c0_i32_1 = arith.constant 0 : i32
    return %c0_i32, %c0_i32_0 : i32, i32
  }
  func.func @transform_3(%arg0: i32, %arg1: i32) -> (i32, i32, i32) {
    %c0_i32 = arith.constant 0 : i32
    %c0_i32_0 = arith.constant 0 : i32
    %c0_i32_1 = arith.constant 0 : i32
    return %arg0, %c0_i32, %c0_i32_0 : i32, i32, i32
  }
}

</mosaic_0001>

<bundles_post_ra>
// kernel: tpu_custom_call.1
= control target key start
LH: loop header
LB: loop body
LE: loop exit
PB: predicated region body
PF: predicated region fallthrough
CT: control target
= control target key end

     0   :  { %8 = vsyncpa [#allocation4], 0  ;;  %s1012_s0 = inlined_call_operand.hbm [shape: f32[2,32,256], index: 0, kind: input, shape index: {}]   ;;  %s1013_s1 = inlined_call_operand.vmem [shape: f32[32,2], index: 1, kind: input, shape index: {}]   ;;  %s1014_s2 = inlined_call_operand.vmem [shape: f32[2,32], index: 2, kind: input, shape index: {}]   ;;  %s1015_s3 = inlined_call_operand.hbm [shape: f32[2,1,32], index: 3, kind: output, shape index: {}]  }
   0x1   :  { %10 = vsyncpa [#allocation4 + $0x1], 0 }
   0x2   :  { %11 = vsyncpa [#allocation5], 0 }
   0x3   :  { %13 = vsyncpa [#allocation5 + $0x1], 0  ;;  %s819_s12 = smov 0   ;;  %s821_s13 = smov 0  }
   0x4   :  { %s823_s14 = smov 0   ;;  %s825_s15 = smov 0  }
   0x5   :  { %s827_s16 = smov 0   ;;  %s829_s17 = smov 0  }
   0x6   :  { %s831_s18 = smov 0   ;;  %s833_s19 = smov 0  }
   0x7   :  { %s835_s20 = smov 0   ;;  %s837_s21 = smov 0  }
   0x8   :  { %s839_s22 = smov 0  }
   0x9 LB: > { %1020 = sst [smem:[#allocation9_spill]] %s760_s14  ;;  %s509_s23 = sadd.s32 4294967295, %s792_s22   ;;  %s792_s22 = sphi %s839_s22, %s19_s22   ;;  %s788_s21 = sphi %s837_s21, %s1044_s21   ;;  %s784_s20 = sphi %s835_s20, %s1043_s20   ;;  %s780_s19 = sphi %s833_s19, %s1042_s19   ;;  %s776_s18 = sphi %s831_s18, %s1041_s18   ;;  %s772_s17 = sphi %s829_s17, %s1033_s17   ;;  %s768_s16 = sphi %s827_s16, %s1040_s16   ;;  %s764_s15 = sphi %s825_s15, %s1039_s15   ;;  %s760_s14 = sphi %s823_s14, %s1038_s14   ;;  %s756_s13 = sphi %s821_s13, %s1037_s13   ;;  %s752_s12 = sphi %s819_s12, %s1036_s12  }
   0xa   : > { %1021 = sst [smem:[#allocation10_spill]] %s772_s17  ;;  %s510_s24 = sadd.s32 4294967294, %s792_s22  }
   0xb   : > { %s28_s25 = sadd.s32 1, %s784_s20  ;;  %s31_s26 = sadd.s32 1, %s788_s21 }
   0xc   : > { %p29_p0 = scmp.ge.s32.totalorder %s28_s25, 2  ;;  %s40_s27 = sadd.s32 1, %s772_s17 }
   0xd   : > { %p47_p1 = scmp.ne.s32.totalorder %s772_s17, %s768_s16  ;;  %p48_p2 = scmp.eq.s32.totalorder %s792_s22, 0 }
   0xe   : > { %s1046_s25 = smov (%p29_p0, %s28_s25), 0  ;;  %s1048_s26 = smov (!%p29_p0, %s31_s26), %s788_s21 }
   0xf   : > { %1022 = sst [smem:[#allocation11_spill]] %s1046_s25  ;;  %s36_s28 = ssub.s32 %s784_s20, %s1046_s25 }
  0x10   : > { %p885_p3 = por %p48_p2, %p47_p1  ;;  %p33_p4 = scmp.ge.s32.totalorder %s1048_s26, 2 }
  0x11   : > { %p53_p5 = scmp.ne.s32.totalorder %s768_s16, %s764_s15  ;;  %p54_p6 = scmp.eq.s32.totalorder %s509_s23, 0 }
  0x12   : > { %s108_s30 = sadd.s32 1, %s760_s14  ;;  %s1050_s26 = smov (%p33_p4, %s1048_s26), 0 }
  0x13   : > { %1024 = sst [smem:[#allocation12_spill]] %s1050_s26  ;;  %p893_p7 = por %p54_p6, %p53_p5 }
  0x14   : > { %p118_p8 = scmp.ne.s32.totalorder %s760_s14, %s756_s13  ;;  %s35_s5 = ssub.s32 %s788_s21, %s1050_s26 }
  0x15   : > { %p119_p9 = scmp.eq.s32.totalorder %s509_s23, 3  ;;  %s37_s6 = sor.u32 %s36_s28, %s35_s5 }
  0x16   : > { %p106_p10 = scmp.eq.s32.totalorder %s35_s5, 0  ;;  %p38_p11 = scmp.eq.s32.totalorder %s37_s6, 0 }
  0x17   : > { %p901_p12 = por %p119_p9, %p118_p8  ;;  %p124_p13 = scmp.ne.s32.totalorder %s756_s13, %s752_s12 }
  0x18   : > { %s906_s8 = scalar_select %p106_p10, %s760_s14, %s108_s30  }
  0x19   : > { %s909_s9 = scalar_select %p38_p11, %s772_s17, %s40_s27  }
  0x1a   : > { %1027 = sst [smem:[#allocation13_spill]] %s906_s8  ;;  %p125_p0 = scmp.eq.s32.totalorder %s510_s24, 3 }
  0x1b   : > { %1028 = sst [smem:[#allocation14_spill]] %s909_s9  ;;  %p538_p1 = scmp.lt.s32.totalorder %s792_s22, 4 }
  0x1c   : > { %p914_p2 = por %p125_p0, %p124_p13  ;;  %s151_s11 = sand.u32 1, %s772_s17  }
  0x1d   : > { %s513_s15 = sshll.u32 %s151_s11, 5  ;;  %s514_s23 = sshll.u32 %s788_s21, 3 }
  0x1e   : > { %s159_s28 = sadd.s32 %s784_s20, %s514_s23  ;;  %s155_s5 = scalar_lea.vmem [#allocation3], %s513_s15 }
  0x1f   : > { %s164_s6 = sshll.u32 %s155_s5, 4  ;;  %s515_s26 = sshll.u32 %s159_s28, 3  ;;  %s165_s6 = int_to_ptr.vmem [resolvable:$true] %s164_s6 }
  0x20   : > { %s161_s25 = scalar_lea.hbm %s1012_s0, %s515_s26  ;;  %p531_p4 = pnand %p538_p1, %p885_p3 }
  0x21   : > { %s162_s24 = sshll.u32 %s161_s25, 4  ;;  %s152_s9 = scalar_lea.sflag [#allocation4], %s151_s11  ;;  %s163_s24 = int_to_ptr.hbm [resolvable:$true] %s162_s24 }
  0x22   : > { %s794_s8 = smov 256   ;;  %s795_s17 = smov 128  }
  0x23   : > { %s796_s14 = smov 8   ;;  %p516_p5 = scmp.ge.s32.totalorder %s792_s22, 1 }
  0x24   : > { %533 = dma.hbm_to_vmem [thread:$0]  (!%p531_p4), %s163_s24, 512, %s165_s6, %s152_s9, %s794_s8, %s795_s17, %s796_s14  }
  0x25   : > { %p172_p6 = scmp.lt.s32.totalorder %s792_s22, 5 }
  0x27   : > { %p173_p8 = pnand %p516_p5, %p172_p6 }
  0x28   : > { %s178_s15 = sand.u32 (!%p173_p8), 1, %s768_s16  }
  0x29   : > { %176 = sbr.rel (%p173_p8) target bundleno = 661 (0x295), region = 32  ;;  %s517_s23 = sshll.u32 (!%p173_p8), %s178_s15, 5 }
  0x2a   : > { %s179_s28 = scalar_lea.sflag (!%p173_p8), [#allocation4], %s178_s15  ;;  %s182_s5 = scalar_lea.vmem (!%p173_p8), [#allocation3], %s517_s23 }
  0x2e   : > { %743 = dma.done.wait (%p893_p7), %s179_s28, 512  }
  0x2f   : > { %745 = vsyncadd (%p893_p7), %s179_s28, 4294966784  ;;  %s203_s25 = sand.u32 1, %s756_s13   ;;  %p518_p3 = scmp.ne.s32.totalorder %s776_s18, 0 }
  0x30   : > { %s936_s14 = scalar_lea.vmem [#allocation6], %s203_s25 }
  0x31   : > { %208 = sbr.rel (%p518_p3) target bundleno = 56 (0x38), region = 40 }
  0x36   : > { %vm209_vm0 = vcmask 253952   ;;  %v797_v0 = vmov -inf  }
  0x37   : > { %210 = vst.msk [vmem:[#allocation2] sm:$0x1] %vm209_vm0, %v797_v0 }
  0x38 PF: > { %v211_v1 = vld [vmem:[%s182_s5] sm:$0xff]  ;;  %v213_v2 = vld [vmem:[%s182_s5 + $0x10] sm:$0xff]  ;;  %v212_v3 = vld [vmem:[%s182_s5 + $0x8] sm:$0xff]  ;;  %v798_v5 = vmov 0   ;;  %v315_v47 = vlaneseq  ;;  %vm320_vm1 = vcmask 130112   ;;  %vm324_vm2 = vcmask 195712  }
  0x39   : > { %215 = vmax.xlane.f32.xlu0 %v211_v1  ;;  %219 = vmax.xlane.f32.xlu1 %v213_v2  ;;  %v214_v4 = vld [vmem:[%s182_s5 + $0x18] sm:$0xff]  ;;  %vm328_vm3 = vcmask 261312   ;;  %vm332_vm4 = vcmask 253952   ;;  %p519_p7 = scmp.ne.s32.totalorder %s776_s18, 1 }
  0x3a   : > { %633 = vset.pattern.permute.xlu2 %v798_v5  ;;  %634 = vset.pattern.permute.xlu0 %v798_v5  ;;  %v316_v48 = vand.u32 127, %v315_v47 }
  0x3b   : > { %635 = vset.pattern.permute.xlu1 %v798_v5 }
  0x3c   : > { %v318_v49 = vadd.s32 4294967288, %v316_v48  ;;  %v322_v51 = vadd.s32 4294967280, %v316_v48  ;;  %v326_v54 = vadd.s32 4294967272, %v316_v48 }
  0x3e   : > { %v223_v59 = vld [vmem:[#allocation2] sm:$0x1] }
  0x41   : > { %217 = vmax.xlane.f32.xlu0 %v212_v3  ;;  %221 = vmax.xlane.f32.xlu1 %v214_v4 }
  0xac   : > { %v216_v6 = vpop.xlane.xlu0 %215  ;;  %v220_v25 = vpop.xlane.xlu1 %219 }
  0xad   : > { %v228_v7 = vperm.slane %v216_v6, 0  ;;  %v229_v8 = vperm.slane %v216_v6, 1  ;;  %v230_v9 = vperm.slane %v216_v6, 2  ;;  %v231_v10 = vperm.slane %v216_v6, 3 }
  0xae   : > { %v232_v11 = vperm.slane %v216_v6, 4  ;;  %v233_v12 = vperm.slane %v216_v6, 5  ;;  %v234_v13 = vperm.slane %v216_v6, 6  ;;  %v235_v14 = vperm.slane %v216_v6, 7 }
  0xaf   : > { %260 = vst [vmem:[#allocation1] ss:$9 sm:$0xff] %v228_v7  ;;  %v244_v26 = vperm.slane %v220_v25, 0  ;;  %v245_v27 = vperm.slane %v220_v25, 1  ;;  %v246_v28 = vperm.slane %v220_v25, 2  ;;  %v247_v30 = vperm.slane %v220_v25, 3 }
  0xb0   : > { %262 = vst [vmem:[#allocation1 + $0x1] ss:$9 sm:$0xff] %v229_v8  ;;  %v248_v31 = vperm.slane %v220_v25, 4  ;;  %v249_v32 = vperm.slane %v220_v25, 5  ;;  %v250_v33 = vperm.slane %v220_v25, 6  ;;  %v251_v34 = vperm.slane %v220_v25, 7 }
  0xb1   : > { %264 = vst [vmem:[#allocation1 + $0x2] ss:$9 sm:$0xff] %v230_v9 }
  0xb2   : > { %266 = vst [vmem:[#allocation1 + $0x3] ss:$9 sm:$0xff] %v231_v10 }
  0xb3   : > { %268 = vst [vmem:[#allocation1 + $0x4] ss:$9 sm:$0xff] %v232_v11 }
  0xb4   : > { %270 = vst [vmem:[#allocation1 + $0x5] ss:$9 sm:$0xff] %v233_v12  ;;  %v218_v15 = vpop.xlane.xlu0 %217  ;;  %v222_v35 = vpop.xlane.xlu1 %221 }
  0xb5   : > { %272 = vst [vmem:[#allocation1 + $0x6] ss:$9 sm:$0xff] %v234_v13  ;;  %v236_v16 = vperm.slane %v218_v15, 0  ;;  %v237_v17 = vperm.slane %v218_v15, 1  ;;  %v238_v18 = vperm.slane %v218_v15, 2  ;;  %v239_v20 = vperm.slane %v218_v15, 3 }
  0xb6   : > { %274 = vst [vmem:[#allocation1 + $0x7] ss:$9 sm:$0xff] %v235_v14  ;;  %v240_v21 = vperm.slane %v218_v15, 4  ;;  %v241_v22 = vperm.slane %v218_v15, 5  ;;  %v242_v23 = vperm.slane %v218_v15, 6  ;;  %v243_v24 = vperm.slane %v218_v15, 7 }
  0xb7   : > { %v252_v36 = vperm.slane %v222_v35, 0  ;;  %v253_v37 = vperm.slane %v222_v35, 1  ;;  %v254_v38 = vperm.slane %v222_v35, 2  ;;  %v255_v39 = vperm.slane %v222_v35, 3 }
  0xb8   : > { %v256_v41 = vperm.slane %v222_v35, 4  ;;  %v257_v42 = vperm.slane %v222_v35, 5  ;;  %v258_v43 = vperm.slane %v222_v35, 6  ;;  %v259_v44 = vperm.slane %v222_v35, 7 }
  0xbd   : > { %v275_v19 = vld [vmem:[#allocation1] sm:$0xff] }
  0xbe   : > { %276 = vst [vmem:[#allocation1] ss:$9 sm:$0xff] %v236_v16  ;;  %304 = vperm.xlu2 %633, %v275_v19  }
  0xbf   : > { %277 = vst [vmem:[#allocation1 + $0x1] ss:$9 sm:$0xff] %v237_v17 }
  0xc0   : > { %278 = vst [vmem:[#allocation1 + $0x2] ss:$9 sm:$0xff] %v238_v18 }
  0xc1   : > { %279 = vst [vmem:[#allocation1 + $0x3] ss:$9 sm:$0xff] %v239_v20 }
  0xc2   : > { %280 = vst [vmem:[#allocation1 + $0x4] ss:$9 sm:$0xff] %v240_v21 }
  0xc3   : > { %281 = vst [vmem:[#allocation1 + $0x5] ss:$9 sm:$0xff] %v241_v22 }
  0xc4   : > { %282 = vst [vmem:[#allocation1 + $0x6] ss:$9 sm:$0xff] %v242_v23 }
  0xc5   : > { %283 = vst [vmem:[#allocation1 + $0x7] ss:$9 sm:$0xff] %v243_v24 }
  0xcc   : > { %v284_v29 = vld [vmem:[#allocation1] sm:$0xff] }
  0xcd   : > { %285 = vst [vmem:[#allocation1] ss:$9 sm:$0xff] %v244_v26  ;;  %307 = vperm.xlu2 %633, %v284_v29  }
  0xce   : > { %286 = vst [vmem:[#allocation1 + $0x1] ss:$9 sm:$0xff] %v245_v27 }
  0xcf   : > { %287 = vst [vmem:[#allocation1 + $0x2] ss:$9 sm:$0xff] %v246_v28 }
  0xd0   : > { %288 = vst [vmem:[#allocation1 + $0x3] ss:$9 sm:$0xff] %v247_v30 }
  0xd1   : > { %289 = vst [vmem:[#allocation1 + $0x4] ss:$9 sm:$0xff] %v248_v31 }
  0xd2   : > { %290 = vst [vmem:[#allocation1 + $0x5] ss:$9 sm:$0xff] %v249_v32 }
  0xd3   : > { %291 = vst [vmem:[#allocation1 + $0x6] ss:$9 sm:$0xff] %v250_v33 }
  0xd4   : > { %292 = vst [vmem:[#allocation1 + $0x7] ss:$9 sm:$0xff] %v251_v34 }
  0xdb   : > { %v293_v40 = vld [vmem:[#allocation1] sm:$0xff] }
  0xdc   : > { %310 = vperm.xlu0 %634, %v293_v40   ;;  %294 = vst [vmem:[#allocation1] ss:$9 sm:$0xff] %v252_v36 }
  0xdd   : > { %295 = vst [vmem:[#allocation1 + $0x1] ss:$9 sm:$0xff] %v253_v37 }
  0xde   : > { %296 = vst [vmem:[#allocation1 + $0x2] ss:$9 sm:$0xff] %v254_v38 }
  0xdf   : > { %297 = vst [vmem:[#allocation1 + $0x3] ss:$9 sm:$0xff] %v255_v39 }
  0xe0   : > { %298 = vst [vmem:[#allocation1 + $0x4] ss:$9 sm:$0xff] %v256_v41 }
  0xe1   : > { %299 = vst [vmem:[#allocation1 + $0x5] ss:$9 sm:$0xff] %v257_v42 }
  0xe2   : > { %300 = vst [vmem:[#allocation1 + $0x6] ss:$9 sm:$0xff] %v258_v43 }
  0xe3   : > { %301 = vst [vmem:[#allocation1 + $0x7] ss:$9 sm:$0xff] %v259_v44 }
  0xea   : > { %v302_v45 = vld [vmem:[#allocation1] sm:$0xff] }
  0xeb   : > { %313 = vperm.xlu1 %635, %v302_v45  }
 0x118   : > { %v305_v46 = vpop.permute.xlu2 %304 }
 0x119   : > { %v317_v56 = vperm.slane %v305_v46, %v316_v48 }
 0x127   : > { %v308_v50 = vpop.permute.xlu2 %307 }
 0x128   : > { %v319_v53 = vperm.slane %v308_v50, %v318_v49 }
 0x12a   : > { %v321_v58 = vsel %vm320_vm1, %v319_v53, %v317_v56 }
 0x14e   : > { %v311_v52 = vpop.permute.xlu0 %310 }
 0x14f   : > { %v323_v55 = vperm.slane %v311_v52, %v322_v51 }
 0x151   : > { %v325_v61 = vsel %vm324_vm2, %v323_v55, %v321_v58 }
 0x15d   : > { %v314_v57 = vpop.permute.xlu1 %313 }
 0x15e   : > { %v327_v60 = vperm.slane %v314_v57, %v326_v54 }
 0x15f   : > { %337 = sbr.rel (%p519_p7) target bundleno = 647 (0x287), region = 44 }
 0x160   : > { %v329_v62 = vsel %vm328_vm3, %v327_v60, %v325_v61 }
 0x161   : > { %v331_v63 = vmax.f32 %v223_v59, %v329_v62 }
 0x163   : > { %333 = vst.msk [vmem:[#allocation2] sm:$0x1] %vm332_vm4, %v331_v63 }
 0x164   : > { %v342_v0 = vld [vmem:[%s1013_s1 + $0x18] sm:$0xff]  ;;  %v341_v1 = vld [vmem:[%s1013_s1 + $0x10] sm:$0xff]  ;;  %v340_v2 = vld [vmem:[%s1013_s1 + $0x8] sm:$0xff]  ;;  %vm343_vm5 = vcmask 261120   ;;  %vm373_vm6 = vcmask 1041408   ;;  %vm369_vm7 = vcmask 15360  }
 0x165   : > { %359 = vmatpush.msra.mxu0 %v342_v0  ;;  %v339_v3 = vld [vmem:[%s1013_s1] sm:$0xff] }
 0x166   : > { %v368_v5 = vld [vmem:[%s1014_s2] sm:$0x3] }
 0x167   : > { %360 = vmatpush.msra.mxu0 %v341_v1  ;;  %521 = vmatpush.msk.msra.mxu1 %vm373_vm6, %v368_v5 }
 0x169   : > { %361 = vmatpush.msra.mxu0 %v340_v2 }
 0x16a   : > { %v338_v4 = vld [vmem:[#allocation2] sm:$0x1] }
 0x16b   : > { %362 = vmatpush.msra.mxu0 %v339_v3 }
 0x16c   : > { %520 = vmatmul.msk.f32.vlgmr.msra.gmra.mxu0 %vm343_vm5, %v338_v4 }
 0x1e9   : > { %v364_v6 = vpop.f32.mrf.mxu0 }
 0x1ea   : > { %v367_v7 = vmax.f32 %v364_v6, 0.0 }
 0x1ec   : > { %522 = vmatmul.msk.f32.vlgmr.msra.gmra.mxu1 %vm369_vm7, %v367_v7 }
 0x269   : > { %v394_v8 = vpop.f32.mrf.mxu1 }
 0x26a   : > { %v523_v9 = vmul.f32 -1.442695, %v394_v8 }
 0x26c   : > { %636 = vpow2.f32 %v523_v9 }
 0x272   : > { %v637_v10 = vpop.eup %636 }
 0x273   : > { %v400_v11 = vadd.f32 1.0, %v637_v10 }
 0x275   : > { %638 = vrcp.f32 %v400_v11  ;;  %v412_v15 = vand.u32 2147483648, %v400_v11  ;;  %v410_v17 = vand.u32 2147483647, %v400_v11  ;;  %vm406_vm9 = vweird.f32 %v400_v11 }
 0x277   : > { %v413_v19 = vor.u32 1.1754944e-38, %v412_v15  ;;  %vm411_vm11 = vcmp.eq.f32.partialorder %v410_v17, 8.507059e+37 }
 0x27b   : > { %v639_v12 = vpop.eup %638 }
 0x27c   : > { %v402_v13 = vmul.f32 %v639_v12, %v400_v11  ;;  %vm407_vm8 = vweird.f32 %v639_v12 }
 0x27d   : > { %vm408_vm10 = vmor %vm406_vm9, %vm407_vm8 }
 0x27e   : > { %v403_v14 = vsub.f32 1.0, %v402_v13 }
 0x280   : > { %v404_v16 = vmul.f32 %v639_v12, %v403_v14 }
 0x282   : > { %v405_v18 = vadd.f32 %v639_v12, %v404_v16 }
 0x284   : > { %v409_v20 = vsel %vm408_vm10, %v639_v12, %v405_v18 }
 0x285   : > { %v414_v21 = vsel %vm411_vm11, %v413_v19, %v409_v20 }
 0x286   : > { %416 = vst.msk [vmem:[%s936_s14] sm:$0x1] %vm332_vm4, %v414_v21 }
 0x287 PF: > { %s426_s15 = scalar_lea.hbm %s1015_s3, %s780_s19  ;;  %s428_s23 = sshll.u32 %s936_s14, 4  ;;  %s429_s23 = int_to_ptr.vmem [resolvable:$true] %s428_s23 }
 0x288   : > { %s430_s28 = sshll.u32 %s426_s15, 4  ;;  %s418_s5 = scalar_lea.sflag [#allocation5], %s203_s25  ;;  %s431_s28 = int_to_ptr.hbm [resolvable:$true] %s430_s28 }
 0x289   : > { %s684_s17 = sshra.s32 %s431_s28, 4  ;;  %s690_s8 = scalar_lea.hbm %s1015_s3, 2  ;;  %s685_s17 = int_to_ptr.hbm [resolvable:$true] %s684_s17 }
 0x28a   : > { %s686_s26 = scalar_lea.hbm %s685_s17, 1  ;;  %p691_p13 = scmp.lt.s32.totalorder %s685_s17, %s1015_s3 }
 0x28b   : > { %p687_p9 = scmp.ne.s32.totalorder %s685_s17, %s686_s26  ;;  %p692_p0 = scmp.lt.s32.totalorder %s690_s8, %s686_s26 }
 0x28d   : > { %p688_p10 = pnand %p687_p9, %p901_p12  ;;  %p693_p1 = por %p692_p0, %p691_p13 }
 0x28f   : > { %p689_p11 = pneg %p688_p10 }
 0x291   : > { %p694_p4 = pnand %p693_p1, %p689_p11 }
 0x293   : > { %697 = shalt.err (!%p694_p4)
}
 0x294   : > { %528 = dma.vmem_to_hbm [thread:$0]  (%p901_p12), %s429_s23, 16, %s431_s28, %s418_s5  }
 0x295 PF: > { %p539_p5 = scmp.ge.s32.totalorder %s792_s22, 2  ;;  %s442_s19 = sand.u32 1, %s752_s12  }
 0x296   : > { %s443_s25 = scalar_lea.sflag [#allocation5], %s442_s19 }
 0x297   : > { %p535_p6 = pnand %p539_p5, %p914_p2 }
 0x299   : > { %p536_p8 = pneg %p535_p6 }
 0x29b   : > { %747 = dma.done.wait (%p536_p8), %s443_s25, 16  }
 0x29c   : > { %749 = vsyncadd (%p536_p8), %s443_s25, 4294967280  ;;  %s19_s22 = sadd.s32 1, %s792_s22   ;;  %s1030_s14 = sld [smem:[#allocation9_spill]] }
 0x29d   : > { %p16_p3 = scmp.ge.s32.totalorder %s19_s22, 6   ;;  %s1031_s6 = sld [smem:[#allocation13_spill]] }
 0x29e   : > { %s1032_s7 = sld [smem:[#allocation10_spill]]  ;;  %s1036_s12 = smov %s756_s13 }
 0x29f   : > { %s1033_s17 = sld [smem:[#allocation14_spill]]  ;;  %s1039_s15 = smov %s768_s16 }
 0x2a0   : > { %s1034_s30 = sld [smem:[#allocation11_spill]]  ;;  %s1041_s18 = smov %s784_s20 }
 0x2a1   : > { %s1035_s27 = sld [smem:[#allocation12_spill]]  ;;  %s1042_s19 = smov %s788_s21 }
 0x2a2   : > { %s1037_s13 = smov %s1030_s14 }
 0x2a3   : > { %s1038_s14 = smov %s1031_s6  ;;  %18 = sbr.rel (!%p16_p3) target bundleno = 9 (0x9), region = 92 }
 0x2a4   : > { %s1040_s16 = smov %s1032_s7 }
 0x2a6   : > { %s1043_s20 = smov %s1034_s30 }
 0x2a7   : > { %s1044_s21 = smov %s1035_s27 }
 0x2a8   :  { %448 = vsyncpa [#allocation4], 1 }
 0x2a9   :  { %450 = vsyncpa [#allocation4 + $0x1], 1 }
 0x2aa   :  { %451 = vsyncpa [#allocation5], 1 }
 0x2ab   :  { %453 = vsyncpa [#allocation5 + $0x1], 1 }

</bundles_post_ra>
